<compile_context>
chip_gen: v5e
topology: v5e:2x2
jax: 0.10.0
libtpu: 0.0.40
codegen_flags: <defaults>
</compile_context>

<pallas_src>
import functools

import jax
import jax.numpy as jnp
from jax import lax
from jax.experimental import pallas as pl
from jax.experimental.pallas import tpu as pltpu

NEG_INF_FILL = -1e9  # matches torch masked_fill(mask, -1000000000.0)


# ---------------------------------------------------------------------------
# Kernel 1a: fused QKV projection (self-attention: one input, one wide matmul).
# ---------------------------------------------------------------------------
def _fused_qkv_proj_kernel(x_ref, w_ref, b_ref, q_ref, k_ref, v_ref, *, dq):
    x = x_ref[0].astype(jnp.bfloat16)                    # bf16 MXU operand
    y = jnp.dot(x, w_ref[...], preferred_element_type=jnp.float32) + b_ref[...]
    # Slice the (ts, 2*dq+dv) result at lane-aligned 128 boundaries.
    q_ref[0] = y[:, :dq].astype(q_ref.dtype)
    k_ref[0] = y[:, dq:2 * dq].astype(k_ref.dtype)
    v_ref[0] = y[:, 2 * dq:].astype(v_ref.dtype)


def fused_qkv_projection(x, w_fused, b_fused, dq, dv, *, seq_tile=256):
    N, L, Din = x.shape
    ts = min(seq_tile, L)
    assert L % ts == 0
    dtot = 2 * dq + dv

    x_spec = pl.BlockSpec((1, ts, Din), lambda n, i: (n, i, 0))
    w_spec = pl.BlockSpec((Din, dtot), lambda n, i: (0, 0))
    b_spec = pl.BlockSpec((1, dtot), lambda n, i: (0, 0))
    q_spec = pl.BlockSpec((1, ts, dq), lambda n, i: (n, i, 0))
    v_spec = pl.BlockSpec((1, ts, dv), lambda n, i: (n, i, 0))

    kernel = functools.partial(_fused_qkv_proj_kernel, dq=dq)
    return pl.pallas_call(
        kernel,
        out_shape=(
            jax.ShapeDtypeStruct((N, L, dq), jnp.bfloat16),
            jax.ShapeDtypeStruct((N, L, dq), jnp.bfloat16),
            jax.ShapeDtypeStruct((N, L, dv), jnp.bfloat16),
        ),
        grid_spec=pltpu.PrefetchScalarGridSpec(
            num_scalar_prefetch=0,
            grid=(N, L // ts),
            in_specs=[x_spec, w_spec, b_spec],
            out_specs=[q_spec, q_spec, v_spec],
        ),
        compiler_params=pltpu.CompilerParams(
            dimension_semantics=("parallel", "parallel")),
    )(x, w_fused, b_fused)


# ---------------------------------------------------------------------------
# Kernel 1b: general Q / K / V projections (query, key, value differ).
# ---------------------------------------------------------------------------
def _qkv_proj_kernel(xq_ref, xk_ref, xv_ref,
                     wq_ref, bq_ref, wk_ref, bk_ref, wv_ref, bv_ref,
                     q_ref, k_ref, v_ref):
    q_ref[0] = (jnp.dot(xq_ref[0].astype(jnp.bfloat16), wq_ref[...],
                        preferred_element_type=jnp.float32)
                + bq_ref[...]).astype(q_ref.dtype)
    k_ref[0] = (jnp.dot(xk_ref[0].astype(jnp.bfloat16), wk_ref[...],
                        preferred_element_type=jnp.float32)
                + bk_ref[...]).astype(k_ref.dtype)
    v_ref[0] = (jnp.dot(xv_ref[0].astype(jnp.bfloat16), wv_ref[...],
                        preferred_element_type=jnp.float32)
                + bv_ref[...]).astype(v_ref.dtype)


def qkv_projection(xq, xk, xv, wq, bq, wk, bk, wv, bv, *, seq_tile=256):
    N, L, Din = xq.shape
    assert xk.shape[1] == L and xv.shape[1] == L
    Dq = wq.shape[1]
    Dv = wv.shape[1]
    ts = min(seq_tile, L)
    assert L % ts == 0

    x_spec = pl.BlockSpec((1, ts, Din), lambda n, i: (n, i, 0))

    def full(shape):
        return pl.BlockSpec(shape, lambda n, i, nd=len(shape): (0,) * nd)

    return pl.pallas_call(
        _qkv_proj_kernel,
        out_shape=(
            jax.ShapeDtypeStruct((N, L, Dq), jnp.bfloat16),
            jax.ShapeDtypeStruct((N, L, Dq), jnp.bfloat16),
            jax.ShapeDtypeStruct((N, L, Dv), jnp.bfloat16),
        ),
        grid_spec=pltpu.PrefetchScalarGridSpec(
            num_scalar_prefetch=0,
            grid=(N, L // ts),
            in_specs=[x_spec, x_spec, x_spec,
                      full(wq.shape), full(bq.shape),
                      full(wk.shape), full(bk.shape),
                      full(wv.shape), full(bv.shape)],
            out_specs=[pl.BlockSpec((1, ts, Dq), lambda n, i: (n, i, 0)),
                       pl.BlockSpec((1, ts, Dq), lambda n, i: (n, i, 0)),
                       pl.BlockSpec((1, ts, Dv), lambda n, i: (n, i, 0))],
        ),
        compiler_params=pltpu.CompilerParams(
            dimension_semantics=("parallel", "parallel")),
    )(xq, xk, xv, wq, bq, wk, bk, wv, bv)


# ---------------------------------------------------------------------------
# Kernel 2: scaled-dot-product attention, flash-style online softmax.
#   Q already carries the 1/sqrt(dim_q) scale (folded into the projection).
# ---------------------------------------------------------------------------
def _flash_attn_kernel(*refs, has_mask):
    if has_mask:
        mask_ref, q_ref, k_ref, v_ref, o_ref, m_sc, l_sc, acc_sc = refs
    else:
        q_ref, k_ref, v_ref, o_ref, m_sc, l_sc, acc_sc = refs
        mask_ref = None

    ki = pl.program_id(2)

    @pl.when(ki == 0)
    def _():
        m_sc[...] = jnp.full(m_sc.shape, -jnp.inf, m_sc.dtype)
        l_sc[...] = jnp.zeros(l_sc.shape, l_sc.dtype)
        acc_sc[...] = jnp.zeros(acc_sc.shape, acc_sc.dtype)

    # Q @ K^T with bf16 operands, f32 accumulation; contract last dims
    # directly (no explicit transpose -> no XLU work).
    s = lax.dot_general(q_ref[0], k_ref[0], (((1,), (1,)), ((), ())),
                        preferred_element_type=jnp.float32)
    if has_mask:
        s = jnp.where(mask_ref[0] != 0, NEG_INF_FILL, s)

    m_prev = m_sc[...]
    m_new = jnp.maximum(m_prev, jnp.max(s, axis=-1, keepdims=True))
    alpha = jnp.exp(m_prev - m_new)
    p = jnp.exp(s - m_new)                               # f32 softmax stats
    l_sc[...] = alpha * l_sc[...] + jnp.sum(p, axis=-1, keepdims=True)
    acc_sc[...] = alpha * acc_sc[...] + jnp.dot(
        p.astype(v_ref.dtype), v_ref[0], preferred_element_type=jnp.float32)
    m_sc[...] = m_new

    @pl.when(ki == pl.num_programs(2) - 1)
    def _():
        inv_l = pl.reciprocal(l_sc[...], approx=True)    # EUP slot (free-ish)
        o_ref[0] = (acc_sc[...] * inv_l).astype(o_ref.dtype)


def flash_attention(q, k, v, mask=None, *, tq=256, tk=256,
                    out_dtype=jnp.float32):
    N, Lq, Dq = q.shape
    Lk = k.shape[1]
    Dv = v.shape[2]
    tq = min(tq, Lq)
    tk = min(tk, Lk)
    assert Lq % tq == 0 and Lk % tk == 0
    has_mask = mask is not None

    q_spec = pl.BlockSpec((1, tq, Dq), lambda n, qi, ki: (n, qi, 0))
    k_spec = pl.BlockSpec((1, tk, Dq), lambda n, qi, ki: (n, ki, 0))
    v_spec = pl.BlockSpec((1, tk, Dv), lambda n, qi, ki: (n, ki, 0))
    o_spec = pl.BlockSpec((1, tq, Dv), lambda n, qi, ki: (n, qi, 0))

    in_specs = [q_spec, k_spec, v_spec]
    args = [q, k, v]
    if has_mask:
        in_specs = [pl.BlockSpec((1, tq, tk),
                                 lambda n, qi, ki: (n, qi, ki))] + in_specs
        args = [mask.astype(jnp.int8)] + args            # int8, not f32: 4x less DMA

    kernel = functools.partial(_flash_attn_kernel, has_mask=has_mask)
    return pl.pallas_call(
        kernel,
        out_shape=jax.ShapeDtypeStruct((N, Lq, Dv), out_dtype),
        grid_spec=pltpu.PrefetchScalarGridSpec(
            num_scalar_prefetch=0,
            grid=(N, Lq // tq, Lk // tk),
            in_specs=in_specs,
            out_specs=o_spec,
            scratch_shapes=[pltpu.VMEM((tq, 1), jnp.float32),
                            pltpu.VMEM((tq, 1), jnp.float32),
                            pltpu.VMEM((tq, Dv), jnp.float32)],
        ),
        compiler_params=pltpu.CompilerParams(
            dimension_semantics=("parallel", "parallel", "arbitrary")),
    )(*args)


# ---------------------------------------------------------------------------
# SelfAttention forward = QKV projection + scaled dot-product attention.
# ---------------------------------------------------------------------------
def self_attention(query, key, value, params, mask=None,
                   *, seq_tile=256, tq=256, tk=256):
    dim_q = params["wq"].shape[1]
    dim_v = params["wv"].shape[1]
    # torch divides QK^T by query.shape[-1]**0.5 where query = Q (dim_q wide);
    # fold the scale into the Q projection so the kernel never multiplies s.
    scale = 1.0 / (float(dim_q) ** 0.5)
    wq_s = params["wq"] * scale
    bq_s = params["bq"] * scale

    if query is key and key is value:
        # Self-attention fast path: one input read, one fused wide matmul.
        w_fused = jnp.concatenate(
            [wq_s, params["wk"], params["wv"]], axis=1).astype(jnp.bfloat16)
        b_fused = jnp.concatenate(
            [bq_s, params["bk"], params["bv"]], axis=1).astype(jnp.float32)
        q, k, v = fused_qkv_projection(query, w_fused, b_fused,
                                       dim_q, dim_v, seq_tile=seq_tile)
    else:
        q, k, v = qkv_projection(
            query, key, value,
            wq_s.astype(jnp.bfloat16), bq_s,
            params["wk"].astype(jnp.bfloat16), params["bk"],
            params["wv"].astype(jnp.bfloat16), params["bv"],
            seq_tile=seq_tile)
    return flash_attention(q, k, v, mask, tq=tq, tk=tk, out_dtype=query.dtype)


def init_params(key, dim_in, dim_q, dim_v):
    """Deterministic synthetic parameters (weights pre-transposed: x @ W)."""
    ks = jax.random.split(key, 6)
    u = lambda k, s: jax.random.uniform(k, s, jnp.float32, -0.1, 0.1)
    return {
        "wq": u(ks[0], (dim_in, dim_q)), "bq": u(ks[1], (1, dim_q)),
        "wk": u(ks[2], (dim_in, dim_q)), "bk": u(ks[3], (1, dim_q)),
        "wv": u(ks[4], (dim_in, dim_v)), "bv": u(ks[5], (1, dim_v)),
    }


def self_attention_ref(query, key, value, params, mask=None):
    """Pure-JAX f32 reference mirroring the PyTorch forward."""
    Q = query @ params["wq"] + params["bq"]
    K = key @ params["wk"] + params["bk"]
    V = value @ params["wv"] + params["bv"]
    M = Q.shape[-1]
    s = jnp.einsum("nqd,nkd->nqk", Q, K) / (M ** 0.5)
    if mask is not None:
        s = jnp.where(mask, NEG_INF_FILL, s)
    w = jax.nn.softmax(s, axis=-1)
    return jnp.einsum("nqk,nkd->nqd", w, V)


if __name__ == "__main__":
    N, L = 2, 256                          # batch, sequence length
    DIM_IN, DIM_Q, DIM_V = 128, 128, 128   # (8,128)-aligned embedding dims

    key = jax.random.PRNGKey(0)
    kx, kk, kv, kp, km = jax.random.split(key, 5)
    x = jax.random.normal(kx, (N, L, DIM_IN), jnp.float32)
    xk = jax.random.normal(kk, (N, L, DIM_IN), jnp.float32)
    xv = jax.random.normal(kv, (N, L, DIM_IN), jnp.float32)
    params = init_params(kp, DIM_IN, DIM_Q, DIM_V)
    mask = jax.random.bernoulli(km, 0.15, (N, L, L))     # bool (N, K, K)

    # bf16 MXU operands + bf16 Q/K/V intermediates -> slightly looser tolerance
    # than a pure-f32 pipeline (accumulation and softmax stats stay f32).
    TOL = dict(rtol=2e-2, atol=2e-2)

    # 1) Unmasked self-attention (fused fast path; module's default call).
    y = jax.block_until_ready(self_attention(x, x, x, params, mask=None))
    y_ref = self_attention_ref(x, x, x, params, mask=None)
    assert y.shape == (N, L, DIM_V)
    assert jnp.allclose(y, y_ref, **TOL), "unmasked self-attention mismatch"

    # 2) Masked self-attention (masked_fill(mask, -1e9) semantics).
    ym = jax.block_until_ready(self_attention(x, x, x, params, mask=mask))
    ym_ref = self_attention_ref(x, x, x, params, mask=mask)
    assert jnp.allclose(ym, ym_ref, **TOL), "masked self-attention mismatch"

    # 3) General path (query / key / value differ).
    yg = jax.block_until_ready(self_attention(x, xk, xv, params, mask=None))
    yg_ref = self_attention_ref(x, xk, xv, params, mask=None)
    assert jnp.allclose(yg, yg_ref, **TOL), "general q/k/v mismatch"

    print("KERNEL_OK")
</pallas_src>

<mosaic_0001>
module attributes {stable_mosaic.version = 11 : i64} {
  func.func @_fused_qkv_proj_kernel(%arg0: i32, %arg1: i32, %arg2: memref<1x256x128xf32, #tpu.memory_space<vmem>>, %arg3: memref<128x384xbf16, #tpu.memory_space<vmem>>, %arg4: memref<1x384xf32, #tpu.memory_space<vmem>>, %arg5: memref<1x256x128xbf16, #tpu.memory_space<vmem>>, %arg6: memref<1x256x128xbf16, #tpu.memory_space<vmem>>, %arg7: memref<1x256x128xbf16, #tpu.memory_space<vmem>>) attributes {dimension_semantics = [#tpu.dimension_semantics<parallel>, #tpu.dimension_semantics<parallel>], iteration_bounds = array<i64: 2, 1>, scalar_prefetch = 0 : i64, scratch_operands = 0 : i64, tpu.core_type = #tpu.core_type<tc>, window_params = [{transform_indices = @transform_0, window_bounds = array<i64: 1, 256, 128>}, {pipeline_mode = #tpu.pipeline_mode<synchronous>, transform_indices = @transform_1, window_bounds = array<i64: 128, 384>}, {pipeline_mode = #tpu.pipeline_mode<synchronous>, transform_indices = @transform_2, window_bounds = array<i64: 1, 384>}, {transform_indices = @transform_3, window_bounds = array<i64: 1, 256, 128>}, {transform_indices = @transform_4, window_bounds = array<i64: 1, 256, 128>}, {transform_indices = @transform_5, window_bounds = array<i64: 1, 256, 128>}]} {
    %c0 = arith.constant 0 : index
    %c0_0 = arith.constant 0 : index
    %c0_1 = arith.constant 0 : index
    %0 = vector.load %arg2[%c0, %c0_0, %c0_1] : memref<1x256x128xf32, #tpu.memory_space<vmem>>, vector<1x256x128xf32>
    %1 = vector.shape_cast %0 : vector<1x256x128xf32> to vector<256x128xf32>
    %2 = arith.truncf %1 : vector<256x128xf32> to vector<256x128xbf16>
    %c0_2 = arith.constant 0 : index
    %c0_3 = arith.constant 0 : index
    %3 = vector.load %arg3[%c0_2, %c0_3] : memref<128x384xbf16, #tpu.memory_space<vmem>>, vector<128x384xbf16>
    %cst = arith.constant dense<0.000000e+00> : vector<256x384xf32>
    %4 = tpu.matmul %2, %3, %cst {dimension_numbers = #tpu.dot_dimension_numbers<[1], [0], [0], [1], [0, 0, 1, 1], [], []>} : vector<256x128xbf16>, vector<128x384xbf16>, vector<256x384xf32> -> vector<256x384xf32>
    %c0_4 = arith.constant 0 : index
    %c0_5 = arith.constant 0 : index
    %5 = vector.load %arg4[%c0_4, %c0_5] : memref<1x384xf32, #tpu.memory_space<vmem>>, vector<1x384xf32>
    %6 = vector.broadcast %5 : vector<1x384xf32> to vector<256x384xf32>
    %7 = arith.addf %4, %6 : vector<256x384xf32>
    %8 = vector.extract_strided_slice %7 {offsets = [0, 0], sizes = [256, 128], strides = [1, 1]} : vector<256x384xf32> to vector<256x128xf32>
    %9 = arith.truncf %8 : vector<256x128xf32> to vector<256x128xbf16>
    %c0_6 = arith.constant 0 : index
    %c0_7 = arith.constant 0 : index
    %c0_8 = arith.constant 0 : index
    %10 = vector.load %arg5[%c0_6, %c0_7, %c0_8] : memref<1x256x128xbf16, #tpu.memory_space<vmem>>, vector<1x256x128xbf16>
    %11 = vector.shape_cast %10 : vector<1x256x128xbf16> to vector<256x128xbf16>
    %12 = vector.shape_cast %9 : vector<256x128xbf16> to vector<1x256x128xbf16>
    tpu.vector_store %arg5[%c0_6, %c0_7, %c0_8], %12 {strides = array<i32>} : memref<1x256x128xbf16, #tpu.memory_space<vmem>>, vector<1x256x128xbf16>,
    %13 = vector.extract_strided_slice %7 {offsets = [0, 128], sizes = [256, 128], strides = [1, 1]} : vector<256x384xf32> to vector<256x128xf32>
    %14 = arith.truncf %13 : vector<256x128xf32> to vector<256x128xbf16>
    %c0_9 = arith.constant 0 : index
    %c0_10 = arith.constant 0 : index
    %c0_11 = arith.constant 0 : index
    %15 = vector.load %arg6[%c0_9, %c0_10, %c0_11] : memref<1x256x128xbf16, #tpu.memory_space<vmem>>, vector<1x256x128xbf16>
    %16 = vector.shape_cast %15 : vector<1x256x128xbf16> to vector<256x128xbf16>
    %17 = vector.shape_cast %14 : vector<256x128xbf16> to vector<1x256x128xbf16>
    tpu.vector_store %arg6[%c0_9, %c0_10, %c0_11], %17 {strides = array<i32>} : memref<1x256x128xbf16, #tpu.memory_space<vmem>>, vector<1x256x128xbf16>,
    %18 = vector.extract_strided_slice %7 {offsets = [0, 256], sizes = [256, 128], strides = [1, 1]} : vector<256x384xf32> to vector<256x128xf32>
    %19 = arith.truncf %18 : vector<256x128xf32> to vector<256x128xbf16>
    %c0_12 = arith.constant 0 : index
    %c0_13 = arith.constant 0 : index
    %c0_14 = arith.constant 0 : index
    %20 = vector.load %arg7[%c0_12, %c0_13, %c0_14] : memref<1x256x128xbf16, #tpu.memory_space<vmem>>, vector<1x256x128xbf16>
    %21 = vector.shape_cast %20 : vector<1x256x128xbf16> to vector<256x128xbf16>
    %22 = vector.shape_cast %19 : vector<256x128xbf16> to vector<1x256x128xbf16>
    tpu.vector_store %arg7[%c0_12, %c0_13, %c0_14], %22 {strides = array<i32>} : memref<1x256x128xbf16, #tpu.memory_space<vmem>>, vector<1x256x128xbf16>,
    return
  }
  func.func @transform_0(%arg0: i32, %arg1: i32) -> (i32, i32, i32) {
    %c0_i32 = arith.constant 0 : i32
    %c0_i32_0 = arith.constant 0 : i32
    return %arg0, %arg1, %c0_i32 : i32, i32, i32
  }
  func.func @transform_1(%arg0: i32, %arg1: i32) -> (i32, i32) {
    %c0_i32 = arith.constant 0 : i32
    %c0_i32_0 = arith.constant 0 : i32
    %c0_i32_1 = arith.constant 0 : i32
    return %c0_i32, %c0_i32_0 : i32, i32
  }
  func.func @transform_2(%arg0: i32, %arg1: i32) -> (i32, i32) {
    %c0_i32 = arith.constant 0 : i32
    %c0_i32_0 = arith.constant 0 : i32
    %c0_i32_1 = arith.constant 0 : i32
    return %c0_i32, %c0_i32_0 : i32, i32
  }
  func.func @transform_3(%arg0: i32, %arg1: i32) -> (i32, i32, i32) {
    %c0_i32 = arith.constant 0 : i32
    %c0_i32_0 = arith.constant 0 : i32
    return %arg0, %arg1, %c0_i32 : i32, i32, i32
  }
  func.func @transform_4(%arg0: i32, %arg1: i32) -> (i32, i32, i32) {
    %c0_i32 = arith.constant 0 : i32
    %c0_i32_0 = arith.constant 0 : i32
    return %arg0, %arg1, %c0_i32 : i32, i32, i32
  }
  func.func @transform_5(%arg0: i32, %arg1: i32) -> (i32, i32, i32) {
    %c0_i32 = arith.constant 0 : i32
    %c0_i32_0 = arith.constant 0 : i32
    return %arg0, %arg1, %c0_i32 : i32, i32, i32
  }
}

</mosaic_0001>

<bundles_post_ra>
// kernel: tpu_custom_call.1
= control target key start
LH: loop header
LB: loop body
LE: loop exit
PB: predicated region body
PF: predicated region fallthrough
CT: control target
= control target key end

     0   :  { %s2552_s0 = inlined_call_operand.hbm [shape: f32[2,256,128], index: 0, kind: input, shape index: {}]   ;;  %s2553_s1 = inlined_call_operand.hbm [shape: bf16[128,384], index: 1, kind: input, shape index: {}]   ;;  %s2554_s2 = inlined_call_operand.hbm [shape: f32[1,384], index: 2, kind: input, shape index: {}]   ;;  %s2555_s3 = inlined_call_operand.hbm [shape: bf16[2,256,128], index: 3, kind: output, shape index: {0}]   ;;  %s2556_s4 = inlined_call_operand.hbm [shape: bf16[2,256,128], index: 4, kind: output, shape index: {1}]   ;;  %s2557_s5 = inlined_call_operand.hbm [shape: bf16[2,256,128], index: 5, kind: output, shape index: {2}]  }
   0x1   :  { %2560 = sst [smem:[#allocation17_spill]] %s2553_s1 }
   0x2   :  { %2561 = sst [smem:[#allocation18_spill]] %s2554_s2 }
   0x3   :  { %11 = vsyncpa [#allocation3], 0 }
   0x4   :  { %13 = vsyncpa [#allocation3 + $0x1], 0 }
   0x5   :  { %14 = vsyncpa [#allocation6], 0 }
   0x6   :  { %15 = vsyncpa [#allocation4], 0 }
   0x7   :  { %17 = vsyncpa [#allocation4 + $0x1], 0 }
   0x8   :  { %18 = vsyncpa [#allocation10], 0 }
   0x9   :  { %20 = vsyncpa [#allocation10 + $0x1], 0  ;;  %s2071_s18 = smov 0   ;;  %s2073_s19 = smov 0  }
   0xa   :  { %s2075_s20 = smov 0   ;;  %s2077_s21 = smov 0  }
   0xb   :  { %s2079_s22 = smov 0   ;;  %s2081_s23 = smov 0  }
   0xc LB: > { %s2102_s24 = sadd.s32 4294967295, %s2031_s23   ;;  %s2558_s25 = sadd.s32 4294967294, %s2031_s23   ;;  %s2031_s23 = sphi %s2081_s23, %s26_s23   ;;  %s2027_s22 = sphi %s2079_s22, %s2576_s22   ;;  %s2023_s21 = sphi %s2077_s21, %s2575_s21   ;;  %s2019_s20 = sphi %s2075_s20, %s2574_s20   ;;  %s2015_s19 = sphi %s2073_s19, %s2573_s19   ;;  %s2011_s18 = sphi %s2071_s18, %s2572_s18  }
   0xd   : > { %p60_p0 = scmp.ne.s32.totalorder %s2015_s19, %s2011_s18  ;;  %p61_p1 = scmp.eq.s32.totalorder %s2102_s24, 0 }
   0xe   : > { %p128_p2 = scmp.eq.s32.totalorder %s2102_s24, 1  ;;  %p134_p3 = scmp.eq.s32.totalorder %s2558_s25, 1 }
   0xf   : > { %p2113_p4 = por %p61_p1, %p60_p0  ;;  %p1238_p5 = scmp.ge.s32.totalorder %s2031_s23, 1 }
  0x10   : > { %p2118_p6 = por %p134_p3, %p60_p0  ;;  %p197_p7 = scmp.lt.s32.totalorder %s2031_s23, 3 }
  0x11   : > { %s2564_s1 = sld [smem:[#allocation17_spill]]  ;;  %s2033_s7 = smov [#allocation5]  }
  0x12   : > { %p2126_p8 = pnand %p1238_p5, %p197_p7  ;;  %s210_s8 = sshll.u32 %s2033_s7, 4  ;;  %s211_s8 = int_to_ptr.vmem [resolvable:$true] %s210_s8 }
  0x13   : > { %p1241_p11 = scmp.ge.s32.totalorder %s2031_s23, 2  ;;  %s2566_s2 = sld [smem:[#allocation18_spill]] }
  0x14   : > { %p1712_p9 = pneg %p2126_p8  ;;  %s2034_s12 = smov 192  }
  0x15   : > { %s2035_s13 = smov 12   ;;  %s2036_s14 = smov [#allocation7]  }
  0x16   : > { %p1713_p10 = pnand %p1712_p9, %p61_p1  ;;  %s225_s15 = sshll.u32 %s2036_s14, 4  ;;  %s226_s15 = int_to_ptr.vmem [resolvable:$true] %s225_s15 }
  0x17   : > { %s208_s30 = sshll.u32 %s2564_s1, 4  ;;  %s38_s16 = sadd.s32 1, %s2027_s22  ;;  %s209_s30 = int_to_ptr.hbm [resolvable:$true] %s208_s30 }
  0x18   : > { %1715 = dma.hbm_to_vmem [thread:$0]  (!%p1713_p10), %s209_s30, 3072, %s211_s8, [#allocation6], %s2034_s12, %s2034_s12, %s2035_s13  }
  0x19   : > { %s223_s11 = sshll.u32 %s2566_s2, 4  ;;  %s47_s17 = sadd.s32 1, %s2019_s20  ;;  %s224_s11 = int_to_ptr.hbm [resolvable:$true] %s223_s11 }
  0x1a   : > { %1718 = dma.hbm_to_vmem [thread:$0]  (!%p1713_p10), %s224_s11, 48, %s226_s15, [#allocation6]  }
  0x1b   : > { %p40_p12 = scmp.ge.s32.totalorder %s38_s16, 2  ;;  %p54_p13 = scmp.ne.s32.totalorder %s2019_s20, %s2015_s19 }
  0x1c   : > { %p55_p0 = scmp.eq.s32.totalorder %s2031_s23, 0  ;;  %p1735_p3 = scmp.lt.s32.totalorder %s2031_s23, 2 }
  0x1d   : > { %s2578_s16 = smov (%p40_p12, %s38_s16), 0  ;;  %p2152_p7 = por %p128_p2, %p54_p13 }
  0x1e   : > { %2567 = sst [smem:[#allocation16_spill]] %s2578_s16  ;;  %p2146_p5 = por %p55_p0, %p54_p13 }
  0x1f   : > { %s42_s30 = ssub.s32 %s2027_s22, %s2578_s16  ;;  %s236_s7 = sand.u32 1, %s2019_s20  }
  0x20   : > { %p45_p9 = scmp.eq.s32.totalorder %s42_s30, 0  ;;  %s1242_s8 = sshll.u32 %s236_s7, 8 }
  0x21   : > { %s1359_s9 = sshll.u32 %s2027_s22, 8  ;;  %s240_s15 = scalar_lea.vmem [#allocation2], %s1242_s8 }
  0x22   : > { %s2161_s10 = scalar_select %p45_p9, %s2019_s20, %s47_s17  }
  0x23   : > { %s247_s13 = scalar_lea.hbm %s2552_s0, %s1359_s9  ;;  %s250_s25 = sshll.u32 %s240_s15, 4  ;;  %s251_s25 = int_to_ptr.vmem [resolvable:$true] %s250_s25 }
  0x24   : > { %s248_s14 = sshll.u32 %s247_s13, 4  ;;  %p1720_p2 = pnand %p1735_p3, %p2146_p5  ;;  %s249_s14 = int_to_ptr.hbm [resolvable:$true] %s248_s14 }
  0x25   : > { %s237_s1 = scalar_lea.sflag [#allocation3], %s236_s7  ;;  %s2037_s2 = smov 128  }
  0x26   : > { %s2038_s16 = smov 8   ;;  %262 = sbr.rel (%p2126_p8) target bundleno = 425 (0x1a9), region = 32 }
  0x27   : > { %1722 = dma.hbm_to_vmem [thread:$0]  (!%p1720_p2), %s249_s14, 4096, %s251_s25, %s237_s1, %s2037_s2, %s2037_s2, %s2038_s16  }
  0x28   : > { %s2173_s17 = sand.u32 (!%p2126_p8), 1, %s2015_s19  }
  0x29   : > { %s1246_s30 = sshll.u32 (!%p2126_p8), %s2173_s17, 8  ;;  %s265_s8 = scalar_lea.sflag (!%p2126_p8), [#allocation3], %s2173_s17 }
  0x2a   : > { %s2177_s9 = scalar_lea.vmem (!%p2126_p8), [#allocation2], %s1246_s30 }
  0x2b   : > { %1994 = dma.done.wait (%p2113_p4), %s265_s8, 4096  }
  0x2c   : > { %1996 = vsyncadd (%p2113_p4), %s265_s8, 4294963200 }
  0x2d   : > { %1998 = dma.done.wait (%p61_p1), [#allocation6], 3120  }
  0x2e   : > { %2000 = vsyncadd (%p61_p1), [#allocation6], 4294964176  ;;  %v1338_v0 = vld [vmem:[#allocation5 + $0xa8] sm:$0xf]  ;;  %v1382_v1 = vld [vmem:[#allocation5 + $0xb0] sm:$0xf0] }
  0x2f   : > { %v1381_v2 = vld [vmem:[#allocation5 + $0xac] sm:$0xf]  ;;  %v1339_v3 = vor.u32 %v1382_v1, %v1338_v0  ;;  %v1340_v4 = vld [vmem:[#allocation5 + $0xb4] sm:$0xf0]  ;;  %v1346_v5 = vld [vmem:[#allocation5 + $0xb0] sm:$0xf] }
  0x30   : > { %v1383_v6 = vld [vmem:[#allocation5 + $0xb8] sm:$0xf0]  ;;  %v2187_v7 = vor.u32 %v1381_v2, %v1340_v4  ;;  %v1326_v9 = vld [vmem:[#allocation5 + $0x90] sm:$0xf]  ;;  %v1378_v11 = vld [vmem:[#allocation5 + $0x94] sm:$0xf] }
  0x31   : > { %v2189_v8 = vor.u32 %v1383_v6, %v1346_v5  ;;  %v1379_v10 = vld [vmem:[#allocation5 + $0x98] sm:$0xf0]  ;;  %536 = vmatpush.bf16.msra.mxu0 %v1339_v3  ;;  %1672 = vmatpush.bf16.msra.mxu3 %v1339_v3  ;;  %v1328_v13 = vld [vmem:[#allocation5 + $0x9c] sm:$0xf0]  ;;  %v1334_v14 = vld [vmem:[#allocation5 + $0x98] sm:$0xf] }
  0x32   : > { %v1327_v12 = vor.u32 %v1379_v10, %v1326_v9  ;;  %v1380_v15 = vld [vmem:[#allocation5 + $0xa0] sm:$0xf0]  ;;  %625 = vmatpush.bf16.msra.mxu1 %v2187_v7  ;;  %v2193_v16 = vor.u32 %v1378_v11, %v1328_v13  ;;  %v1314_v18 = vld [vmem:[#allocation5 + $0x78] sm:$0xf]  ;;  %v1375_v20 = vld [vmem:[#allocation5 + $0x7c] sm:$0xf] }
  0x33   : > { %714 = vmatpush.bf16.msra.mxu2 %v2189_v8  ;;  %v2195_v17 = vor.u32 %v1380_v15, %v1334_v14  ;;  %v1376_v19 = vld [vmem:[#allocation5 + $0x80] sm:$0xf0]  ;;  %v1316_v21 = vld [vmem:[#allocation5 + $0x84] sm:$0xf0]  ;;  %v1322_v22 = vld [vmem:[#allocation5 + $0x80] sm:$0xf] }
  0x34   : > { %v1377_v23 = vld [vmem:[#allocation5 + $0x88] sm:$0xf0]  ;;  %v1315_v24 = vor.u32 %v1376_v19, %v1314_v18  ;;  %v2199_v25 = vor.u32 %v1375_v20, %v1316_v21  ;;  %v1302_v27 = vld [vmem:[#allocation5 + $0x60] sm:$0xf]  ;;  %v1372_v29 = vld [vmem:[#allocation5 + $0x64] sm:$0xf] }
  0x35   : > { %537 = vmatpush.bf16.msra.mxu0 %v1327_v12  ;;  %1673 = vmatpush.bf16.msra.mxu3 %v1327_v12  ;;  %v2201_v26 = vor.u32 %v1377_v23, %v1322_v22  ;;  %v1373_v28 = vld [vmem:[#allocation5 + $0x68] sm:$0xf0]  ;;  %v1304_v30 = vld [vmem:[#allocation5 + $0x6c] sm:$0xf0]  ;;  %v1310_v31 = vld [vmem:[#allocation5 + $0x68] sm:$0xf] }
  0x36   : > { %626 = vmatpush.bf16.msra.mxu1 %v2193_v16  ;;  %v1374_v32 = vld [vmem:[#allocation5 + $0x70] sm:$0xf0]  ;;  %v1303_v33 = vor.u32 %v1373_v28, %v1302_v27  ;;  %v2205_v34 = vor.u32 %v1372_v29, %v1304_v30  ;;  %v1290_v36 = vld [vmem:[#allocation5 + $0x48] sm:$0xf]  ;;  %v1369_v38 = vld [vmem:[#allocation5 + $0x4c] sm:$0xf] }
  0x37   : > { %715 = vmatpush.bf16.msra.mxu2 %v2195_v17  ;;  %v2207_v35 = vor.u32 %v1374_v32, %v1310_v31  ;;  %v1370_v37 = vld [vmem:[#allocation5 + $0x50] sm:$0xf0]  ;;  %v1292_v39 = vld [vmem:[#allocation5 + $0x54] sm:$0xf0]  ;;  %v1298_v40 = vld [vmem:[#allocation5 + $0x50] sm:$0xf] }
  0x38   : > { %v1371_v41 = vld [vmem:[#allocation5 + $0x58] sm:$0xf0]  ;;  %v1291_v42 = vor.u32 %v1370_v37, %v1290_v36  ;;  %v2211_v43 = vor.u32 %v1369_v38, %v1292_v39  ;;  %v1278_v45 = vld [vmem:[#allocation5 + $0x30] sm:$0xf]  ;;  %v1366_v47 = vld [vmem:[#allocation5 + $0x34] sm:$0xf] }
  0x39   : > { %538 = vmatpush.bf16.msra.mxu0 %v1315_v24  ;;  %1674 = vmatpush.bf16.msra.mxu3 %v1315_v24  ;;  %v2213_v44 = vor.u32 %v1371_v41, %v1298_v40  ;;  %v1367_v46 = vld [vmem:[#allocation5 + $0x38] sm:$0xf0]  ;;  %v1280_v48 = vld [vmem:[#allocation5 + $0x3c] sm:$0xf0]  ;;  %v1286_v49 = vld [vmem:[#allocation5 + $0x38] sm:$0xf] }
  0x3a   : > { %627 = vmatpush.bf16.msra.mxu1 %v2199_v25  ;;  %v1368_v50 = vld [vmem:[#allocation5 + $0x40] sm:$0xf0]  ;;  %v1279_v51 = vor.u32 %v1367_v46, %v1278_v45  ;;  %v1283_v52 = vor.u32 %v1366_v47, %v1280_v48  ;;  %v1266_v54 = vld [vmem:[#allocation5 + $0x18] sm:$0xf]  ;;  %v1363_v56 = vld [vmem:[#allocation5 + $0x1c] sm:$0xf] }
  0x3b   : > { %716 = vmatpush.bf16.msra.mxu2 %v2201_v26  ;;  %v2217_v53 = vor.u32 %v1368_v50, %v1286_v49  ;;  %v1364_v55 = vld [vmem:[#allocation5 + $0x20] sm:$0xf0]  ;;  %v1268_v57 = vld [vmem:[#allocation5 + $0x24] sm:$0xf0]  ;;  %v1274_v58 = vld [vmem:[#allocation5 + $0x20] sm:$0xf] }
  0x3c   : > { %v1365_v59 = vld [vmem:[#allocation5 + $0x28] sm:$0xf0]  ;;  %v1267_v60 = vor.u32 %v1364_v55, %v1266_v54  ;;  %v1271_v61 = vor.u32 %v1363_v56, %v1268_v57  ;;  %v1254_v63 = vld [vmem:[#allocation5] sm:$0xf]  ;;  %v1360_v1 = vld [vmem:[#allocation5 + $0x4] sm:$0xf] }
  0x3d   : > { %539 = vmatpush.bf16.msra.mxu0 %v1303_v33  ;;  %1675 = vmatpush.bf16.msra.mxu3 %v1303_v33  ;;  %v2220_v62 = vor.u32 %v1365_v59, %v1274_v58  ;;  %v1361_v0 = vld [vmem:[#allocation5 + $0x8] sm:$0xf0]  ;;  %v1256_v2 = vld [vmem:[#allocation5 + $0xc] sm:$0xf0]  ;;  %v1262_v3 = vld [vmem:[#allocation5 + $0x8] sm:$0xf] }
  0x3e   : > { %628 = vmatpush.bf16.msra.mxu1 %v2205_v34  ;;  %v1362_v4 = vld [vmem:[#allocation5 + $0x10] sm:$0xf0]  ;;  %v320_v5 = vld [vmem:[%s2177_s9] sm:$0xff]  ;;  %v1255_v6 = vor.u32 %v1361_v0, %v1254_v63  ;;  %v321_v9 = vld [vmem:[%s2177_s9 + $0x8] sm:$0xff]  ;;  %v1259_v12 = vor.u32 %v1360_v1, %v1256_v2  ;;  %s1249_s1 = sshll.u32 %s2173_s17, 7  ;;  %s1384_s6 = sshll.u32 %s2023_s21, 7 }
  0x3f   : > { %717 = vmatpush.bf16.msra.mxu2 %v2207_v35  ;;  %v344_v10 = vld [vmem:[%s2177_s9 + $0xc0] sm:$0xff]  ;;  %v345_v11 = vld [vmem:[%s2177_s9 + $0xc8] sm:$0xff]  ;;  %v1263_v13 = vor.u32 %v1362_v4, %v1262_v3  ;;  %v352_v14 = vpack.c.bf16 %v321_v9, %v320_v5  ;;  %v322_v18 = vld [vmem:[%s2177_s9 + $0x10] sm:$0xff]  ;;  %s2291_s2 = scalar_lea.vmem [#allocation8], %s1249_s1  ;;  %s2294_s25 = scalar_lea.vmem [#allocation9], %s1249_s1 }
  0x40   : > { %v2227_v15 = vpack.c.bf16 %v345_v11, %v344_v10  ;;  %v323_v19 = vld [vmem:[%s2177_s9 + $0x18] sm:$0xff]  ;;  %v346_v20 = vld [vmem:[%s2177_s9 + $0xd0] sm:$0xff]  ;;  %v325_v23 = vld [vmem:[%s2177_s9 + $0x28] sm:$0xff]  ;;  %s2303_s26 = scalar_lea.vmem [#allocation11], %s1249_s1  ;;  %s1000_s16 = sand.u32 1, %s2102_s24  }
  0x41   : > { %540 = vmatpush.bf16.msra.mxu0 %v1291_v42  ;;  %1676 = vmatpush.bf16.msra.mxu3 %v1291_v42  ;;  %v347_v21 = vld [vmem:[%s2177_s9 + $0xd8] sm:$0xff]  ;;  %v348_v24 = vld [vmem:[%s2177_s9 + $0xe0] sm:$0xff]  ;;  %v326_v29 = vld [vmem:[%s2177_s9 + $0x30] sm:$0xff]  ;;  %s1038_s11 = scalar_lea.hbm %s2556_s4, %s1384_s6  ;;  %s1039_s12 = sshll.u32 %s2294_s25, 4  ;;  %s2450_s12 = int_to_ptr.vmem [resolvable:$true] %s1039_s12 }
  0x42   : > { %629 = vmatpush.bf16.msra.mxu1 %v2211_v43  ;;  %v2238_v22 = vpack.c.bf16 %v347_v21, %v346_v20  ;;  %v327_v30 = vld [vmem:[%s2177_s9 + $0x38] sm:$0xff]  ;;  %v350_v31 = vld [vmem:[%s2177_s9 + $0xf0] sm:$0xff]  ;;  %v332_v38 = vld [vmem:[%s2177_s9 + $0x60] sm:$0xff]  ;;  %s1019_s15 = scalar_lea.hbm %s2555_s3, %s1384_s6  ;;  %s2443_s21 = sshll.u32 %s1038_s11, 4  ;;  %s1042_s21 = int_to_ptr.hbm [resolvable:$true] %s2443_s21 }
  0x43   : > { %718 = vmatpush.bf16.msra.mxu2 %v2213_v44  ;;  %v351_v32 = vld [vmem:[%s2177_s9 + $0xf8] sm:$0xff]  ;;  %v355_v33 = vpack.c.bf16 %v327_v30, %v326_v29  ;;  %v333_v39 = vld [vmem:[%s2177_s9 + $0x68] sm:$0xff]  ;;  %v334_v41 = vld [vmem:[%s2177_s9 + $0x70] sm:$0xff]  ;;  %s1020_s24 = sshll.u32 %s2291_s2, 4  ;;  %s2448_s30 = sshll.u32 %s1019_s15, 4  ;;  %s2457_s24 = int_to_ptr.vmem [resolvable:$true] %s1020_s24  ;;  %s1023_s30 = int_to_ptr.hbm [resolvable:$true] %s2448_s30 }
  0x44   : > { %v331_v36 = vld [vmem:[%s2177_s9 + $0x58] sm:$0xff]  ;;  %v358_v40 = vpack.c.bf16 %v333_v39, %v332_v38  ;;  %v337_v45 = vld [vmem:[%s2177_s9 + $0x88] sm:$0xff]  ;;  %v400_v49 = vld [vmem:[#allocation7] sm:$0x7]  ;;  %s1057_s1 = scalar_lea.hbm %s2557_s5, %s1384_s6  ;;  %s1058_s7 = sshll.u32 %s2303_s26, 4  ;;  %s1059_s7 = int_to_ptr.vmem [resolvable:$true] %s1058_s7 }
  0x45   : > { %541 = vmatpush.bf16.msra.mxu0 %v1279_v51  ;;  %1677 = vmatpush.bf16.msra.mxu3 %v1279_v51  ;;  %v335_v42 = vld [vmem:[%s2177_s9 + $0x78] sm:$0xff]  ;;  %v2278_v50 = vperm.slane %v400_v49, 0  ;;  %v2280_v51 = vperm.slane %v400_v49, 1  ;;  %v338_v63 = vld [vmem:[%s2177_s9 + $0x90] sm:$0xff]  ;;  %s2461_s28 = sshll.u32 %s1057_s1, 4  ;;  %s2466_s11 = scalar_lea.sflag [#allocation10], %s1000_s16  ;;  %s1061_s28 = int_to_ptr.hbm [resolvable:$true] %s2461_s28 }
  0x46   : > { %630 = vmatpush.bf16.msra.mxu1 %v1283_v52  ;;  %v339_v0 = vld [vmem:[%s2177_s9 + $0x98] sm:$0xff]  ;;  %s1899_s6 = sshra.s32 %s1042_s21, 4  ;;  %s1905_s14 = scalar_lea.hbm %s2556_s4, 256  ;;  %s1900_s6 = int_to_ptr.hbm [resolvable:$true] %s1899_s6 }
  0x47   : > { %719 = vmatpush.bf16.msra.mxu2 %v2217_v53  ;;  %v361_v5 = vpack.c.bf16 %v339_v0, %v338_v63  ;;  %s1901_s13 = scalar_lea.hbm %s1900_s6, 128  ;;  %p1906_p10 = scmp.lt.s32.totalorder %s1900_s6, %s2556_s4 }
  0x48   : > { %p1902_p1 = scmp.ne.s32.totalorder %s1900_s6, %s1901_s13  ;;  %p1907_p12 = scmp.lt.s32.totalorder %s1905_s14, %s1901_s13 }
  0x49   : > { %542 = vmatpush.bf16.msra.mxu0 %v1267_v60  ;;  %1678 = vmatpush.bf16.msra.mxu3 %v1267_v60 }
  0x4a   : > { %631 = vmatpush.bf16.msra.mxu1 %v1271_v61  ;;  %p1903_p4 = pnand %p1902_p1, %p2152_p7  ;;  %p1908_p13 = por %p1907_p12, %p1906_p10 }
  0x4b   : > { %720 = vmatpush.bf16.msra.mxu2 %v2220_v62 }
  0x4c   : > { %p1904_p8 = pneg %p1903_p4 }
  0x4d   : > { %543 = vmatpush.bf16.msra.mxu0 %v1255_v6  ;;  %1679 = vmatpush.bf16.msra.mxu3 %v1255_v6 }
  0x4e   : > { %632 = vmatpush.bf16.msra.mxu1 %v1259_v12  ;;  %p1909_p0 = pnand %p1908_p13, %p1904_p8 }
  0x4f   : > { %721 = vmatpush.bf16.msra.mxu2 %v1263_v13 }
  0x50   : > { %544 = vmatmul.bf16.vlgmr.msra.gmra.mxu0 %v352_v14  ;;  %604 = vmatmul.bf16.vlgmr.msra.gmra.mxu3 %v2227_v15 }
  0x51   : > { %1680 = vmatpush.bf16.msrb.mxu3 %v2187_v7  ;;  %633 = vmatmul.bf16.vlgmr.msra.gmra.mxu1 %v352_v14  ;;  %v353_v7 = vpack.c.bf16 %v323_v19, %v322_v18 }
  0x52   : > { %722 = vmatmul.bf16.vlgmr.msra.gmra.mxu2 %v352_v14 }
  0x55   : > { %1681 = vmatpush.bf16.msrb.mxu3 %v2193_v16  ;;  %v324_v16 = vld [vmem:[%s2177_s9 + $0x20] sm:$0xff] }
  0x56   : > { %v354_v27 = vpack.c.bf16 %v325_v23, %v324_v16 }
  0x59   : > { %1682 = vmatpush.bf16.msrb.mxu3 %v2199_v25  ;;  %v349_v25 = vld [vmem:[%s2177_s9 + $0xe8] sm:$0xff] }
  0x5a   : > { %v2246_v28 = vpack.c.bf16 %v349_v25, %v348_v24  ;;  %v340_v24 = vld [vmem:[%s2177_s9 + $0xa0] sm:$0xff]  ;;  %v341_v25 = vld [vmem:[%s2177_s9 + $0xa8] sm:$0xff] }
  0x5d   : > { %1683 = vmatpush.bf16.msrb.mxu3 %v2205_v34  ;;  %v2257_v34 = vpack.c.bf16 %v351_v32, %v350_v31  ;;  %v362_v32 = vpack.c.bf16 %v341_v25, %v340_v24 }
  0x60   : > { %549 = vmatmul.bf16.gmra.mxu0 %v353_v7  ;;  %609 = vmatmul.bf16.gmra.mxu3 %v2238_v22 }
  0x61   : > { %1684 = vmatpush.bf16.msrb.mxu3 %v2211_v43  ;;  %638 = vmatmul.bf16.gmra.mxu1 %v353_v7  ;;  %v359_v43 = vpack.c.bf16 %v335_v42, %v334_v41 }
  0x62   : > { %727 = vmatmul.bf16.gmra.mxu2 %v353_v7 }
  0x65   : > { %1685 = vmatpush.bf16.msrb.mxu3 %v1283_v52 }
  0x69   : > { %1686 = vmatpush.bf16.msrb.mxu3 %v1271_v61  ;;  %v2287_v61 = vperm.slane %v400_v49, 2 }
  0x6d   : > { %1687 = vmatpush.bf16.msrb.mxu3 %v1259_v12 }
  0x70   : > { %554 = vmatmul.bf16.gmra.mxu0 %v354_v27  ;;  %614 = vmatmul.bf16.gmra.mxu3 %v2246_v28 }
  0x71   : > { %1688 = vmatpush.bf16.msra.mxu3 %v2189_v8  ;;  %643 = vmatmul.bf16.gmra.mxu1 %v354_v27  ;;  %v328_v8 = vld [vmem:[%s2177_s9 + $0x40] sm:$0xff] }
  0x72   : > { %732 = vmatmul.bf16.gmra.mxu2 %v354_v27 }
  0x75   : > { %1689 = vmatpush.bf16.msra.mxu3 %v2195_v17  ;;  %v329_v17 = vld [vmem:[%s2177_s9 + $0x48] sm:$0xff] }
  0x79   : > { %1690 = vmatpush.bf16.msra.mxu3 %v2201_v26  ;;  %v356_v26 = vpack.c.bf16 %v329_v17, %v328_v8 }
  0x7d   : > { %1691 = vmatpush.bf16.msra.mxu3 %v2207_v35  ;;  %v330_v35 = vld [vmem:[%s2177_s9 + $0x50] sm:$0xff] }
  0x7e   : > { %v357_v37 = vpack.c.bf16 %v331_v36, %v330_v35 }
  0x80   : > { %559 = vmatmul.bf16.gmra.mxu0 %v355_v33  ;;  %619 = vmatmul.bf16.gmra.mxu3 %v2257_v34 }
  0x81   : > { %1692 = vmatpush.bf16.msra.mxu3 %v2213_v44  ;;  %648 = vmatmul.bf16.gmra.mxu1 %v355_v33  ;;  %v336_v44 = vld [vmem:[%s2177_s9 + $0x80] sm:$0xff] }
  0x82   : > { %737 = vmatmul.bf16.gmra.mxu2 %v355_v33  ;;  %v360_v46 = vpack.c.bf16 %v337_v45, %v336_v44 }
  0x85   : > { %1693 = vmatpush.bf16.msra.mxu3 %v2217_v53 }
  0x89   : > { %1694 = vmatpush.bf16.msra.mxu3 %v2220_v62 }
  0x8d   : > { %1695 = vmatpush.bf16.msra.mxu3 %v1263_v13 }
  0x90   : > { %564 = vmatmul.bf16.gmra.mxu0 %v356_v26  ;;  %693 = vmatmul.bf16.vlgmr.msrb.gmra.mxu3 %v2227_v15 }
  0x91   : > { %653 = vmatmul.bf16.gmra.mxu1 %v356_v26 }
  0x92   : > { %742 = vmatmul.bf16.gmra.mxu2 %v356_v26 }
  0xa0   : > { %569 = vmatmul.bf16.gmra.mxu0 %v357_v37  ;;  %698 = vmatmul.bf16.gmra.mxu3 %v2238_v22 }
  0xa1   : > { %658 = vmatmul.bf16.gmra.mxu1 %v357_v37 }
  0xa2   : > { %747 = vmatmul.bf16.gmra.mxu2 %v357_v37 }
  0xb0   : > { %574 = vmatmul.bf16.gmra.mxu0 %v358_v40  ;;  %703 = vmatmul.bf16.gmra.mxu3 %v2246_v28 }
  0xb1   : > { %663 = vmatmul.bf16.gmra.mxu1 %v358_v40 }
  0xb2   : > { %752 = vmatmul.bf16.gmra.mxu2 %v358_v40 }
  0xc0   : > { %579 = vmatmul.bf16.gmra.mxu0 %v359_v43  ;;  %708 = vmatmul.bf16.gmra.mxu3 %v2257_v34 }
  0xc1   : > { %668 = vmatmul.bf16.gmra.mxu1 %v359_v43 }
  0xc2   : > { %757 = vmatmul.bf16.gmra.mxu2 %v359_v43 }
  0xcd   : > { %v545_v47 = vpop.f32.mrf.mxu0 }
  0xce   : > { %v634_v48 = vpop.f32.mrf.mxu1  ;;  %v546_v55 = vadd.f32 %v545_v47, %v2278_v50  ;;  %v343_v47 = vld [vmem:[%s2177_s9 + $0xb8] sm:$0xff] }
  0xcf   : > { %v635_v58 = vadd.f32 %v634_v48, %v2280_v51 }
  0xd0   : > { %584 = vmatmul.bf16.gmra.mxu0 %v360_v46  ;;  %782 = vmatmul.bf16.vlgmr.msra.gmra.mxu3 %v2227_v15 }
  0xd1   : > { %673 = vmatmul.bf16.gmra.mxu1 %v360_v46 }
  0xd2   : > { %762 = vmatmul.bf16.gmra.mxu2 %v360_v46 }
  0xd3   : > { %v605_v52 = vpop.f32.mrf.mxu3 }
  0xd4   : > { %v606_v2 = vadd.f32 %v605_v52, %v2278_v50 }
  0xd5   : > { %v723_v53 = vpop.f32.mrf.mxu2  ;;  %v547_v54 = vpop.f32.mrf.mxu0 }
  0xd6   : > { %v548_v56 = vadd.f32 %v547_v54, %v2278_v50  ;;  %v636_v57 = vpop.f32.mrf.mxu1  ;;  %v724_v6 = vadd.f32 %v723_v53, %v2287_v61 }
  0xd7   : > { %v637_v59 = vadd.f32 %v636_v57, %v2280_v51 }
  0xd8   : > { %v1390_v60 = vpack.c.bf16 %v548_v56, %v546_v55 }
  0xd9   : > { %v1470_v62 = vpack.c.bf16 %v637_v59, %v635_v58 }
  0xda   : > { %1391 = vst [vmem:[%s2291_s2] sm:$0xff] %v1390_v60  }
  0xdb   : > { %1471 = vst [vmem:[%s2294_s25] sm:$0xff] %v1470_v62   ;;  %v607_v1 = vpop.f32.mrf.mxu3 }
  0xdc   : > { %v608_v3 = vadd.f32 %v607_v1, %v2278_v50 }
  0xdd   : > { %v725_v4 = vpop.f32.mrf.mxu2  ;;  %v550_v10 = vpop.f32.mrf.mxu0 }
  0xde   : > { %v726_v9 = vadd.f32 %v725_v4, %v2287_v61  ;;  %v1450_v11 = vpack.c.bf16 %v608_v3, %v606_v2  ;;  %v639_v12 = vpop.f32.mrf.mxu1  ;;  %v551_v19 = vadd.f32 %v550_v10, %v2278_v50 }
  0xdf   : > { %v640_v7 = vadd.f32 %v639_v12, %v2280_v51 }
  0xe0   : > { %v1550_v13 = vpack.c.bf16 %v726_v9, %v724_v6  ;;  %1638 = vst [vmem:[%s2291_s2 + $0x60] sm:$0xff] %v1450_v11   ;;  %589 = vmatmul.bf16.gmra.mxu0 %v361_v5  ;;  %787 = vmatmul.bf16.gmra.mxu3 %v2238_v22 }
  0xe1   : > { %678 = vmatmul.bf16.gmra.mxu1 %v361_v5 }
  0xe2   : > { %1551 = vst [vmem:[%s2303_s26] sm:$0xff] %v1550_v13   ;;  %767 = vmatmul.bf16.gmra.mxu2 %v361_v5 }
  0xe3   : > { %v610_v14 = vpop.f32.mrf.mxu3 }
  0xe4   : > { %v611_v29 = vadd.f32 %v610_v14, %v2278_v50 }
  0xe5   : > { %v728_v15 = vpop.f32.mrf.mxu2  ;;  %v552_v18 = vpop.f32.mrf.mxu0 }
  0xe6   : > { %v553_v20 = vadd.f32 %v552_v18, %v2278_v50  ;;  %v641_v21 = vpop.f32.mrf.mxu1  ;;  %v729_v33 = vadd.f32 %v728_v15, %v2287_v61 }
  0xe7   : > { %v642_v22 = vadd.f32 %v641_v21, %v2280_v51 }
  0xe8   : > { %v1395_v16 = vpack.c.bf16 %v553_v20, %v551_v19 }
  0xe9   : > { %v1475_v23 = vpack.c.bf16 %v642_v22, %v640_v7 }
  0xea   : > { %1627 = vst [vmem:[%s2291_s2 + $0x8] sm:$0xff] %v1395_v16  }
  0xeb   : > { %1642 = vst [vmem:[%s2294_s25 + $0x8] sm:$0xff] %v1475_v23   ;;  %v612_v27 = vpop.f32.mrf.mxu3 }
  0xec   : > { %v613_v30 = vadd.f32 %v612_v27, %v2278_v50 }
  0xed   : > { %v730_v31 = vpop.f32.mrf.mxu2  ;;  %v555_v17 = vpop.f32.mrf.mxu0 }
  0xee   : > { %v731_v8 = vadd.f32 %v730_v31, %v2287_v61  ;;  %v1455_v26 = vpack.c.bf16 %v613_v30, %v611_v29  ;;  %v644_v35 = vpop.f32.mrf.mxu1  ;;  %v556_v40 = vadd.f32 %v555_v17, %v2278_v50 }
  0xef   : > { %v645_v43 = vadd.f32 %v644_v35, %v2280_v51 }
  0xf0   : > { %v1555_v36 = vpack.c.bf16 %v731_v8, %v729_v33  ;;  %1639 = vst [vmem:[%s2291_s2 + $0x68] sm:$0xff] %v1455_v26   ;;  %594 = vmatmul.bf16.gmra.mxu0 %v362_v32  ;;  %792 = vmatmul.bf16.gmra.mxu3 %v2246_v28  ;;  %v342_v28 = vld [vmem:[%s2177_s9 + $0xb0] sm:$0xff] }
  0xf1   : > { %683 = vmatmul.bf16.gmra.mxu1 %v362_v32  ;;  %v363_v54 = vpack.c.bf16 %v343_v47, %v342_v28 }
  0xf2   : > { %1657 = vst [vmem:[%s2303_s26 + $0x8] sm:$0xff] %v1555_v36   ;;  %772 = vmatmul.bf16.gmra.mxu2 %v362_v32 }
  0xf3   : > { %v615_v37 = vpop.f32.mrf.mxu3 }
  0xf4   : > { %v616_v49 = vadd.f32 %v615_v37, %v2278_v50 }
  0xf5   : > { %v733_v38 = vpop.f32.mrf.mxu2  ;;  %v557_v39 = vpop.f32.mrf.mxu0 }
  0xf6   : > { %v558_v41 = vadd.f32 %v557_v39, %v2278_v50  ;;  %v646_v42 = vpop.f32.mrf.mxu1  ;;  %v734_v55 = vadd.f32 %v733_v38, %v2287_v61 }
  0xf7   : > { %v647_v44 = vadd.f32 %v646_v42, %v2280_v51 }
  0xf8   : > { %v1400_v45 = vpack.c.bf16 %v558_v41, %v556_v40 }
  0xf9   : > { %v1480_v46 = vpack.c.bf16 %v647_v44, %v645_v43 }
  0xfa   : > { %1628 = vst [vmem:[%s2291_s2 + $0x10] sm:$0xff] %v1400_v45  }
  0xfb   : > { %1643 = vst [vmem:[%s2294_s25 + $0x10] sm:$0xff] %v1480_v46   ;;  %v617_v48 = vpop.f32.mrf.mxu3 }
  0xfc   : > { %v618_v52 = vadd.f32 %v617_v48, %v2278_v50 }
  0xfd   : > { %v735_v53 = vpop.f32.mrf.mxu2  ;;  %v560_v57 = vpop.f32.mrf.mxu0 }
  0xfe   : > { %v736_v56 = vadd.f32 %v735_v53, %v2287_v61  ;;  %v1460_v58 = vpack.c.bf16 %v618_v52, %v616_v49  ;;  %v649_v59 = vpop.f32.mrf.mxu1  ;;  %v561_v1 = vadd.f32 %v560_v57, %v2278_v50 }
  0xff   : > { %v650_v4 = vadd.f32 %v649_v59, %v2280_v51 }
 0x100   : > { %v1560_v60 = vpack.c.bf16 %v736_v56, %v734_v55  ;;  %1640 = vst [vmem:[%s2291_s2 + $0x70] sm:$0xff] %v1460_v58   ;;  %599 = vmatmul.bf16.gmra.mxu0 %v363_v54  ;;  %797 = vmatmul.bf16.gmra.mxu3 %v2257_v34 }
 0x101   : > { %688 = vmatmul.bf16.gmra.mxu1 %v363_v54 }
 0x102   : > { %1658 = vst [vmem:[%s2303_s26 + $0x10] sm:$0xff] %v1560_v60   ;;  %777 = vmatmul.bf16.gmra.mxu2 %v363_v54 }
 0x103   : > { %v620_v62 = vpop.f32.mrf.mxu3 }
 0x104   : > { %v621_v10 = vadd.f32 %v620_v62, %v2278_v50 }
 0x105   : > { %v738_v63 = vpop.f32.mrf.mxu2  ;;  %v562_v0 = vpop.f32.mrf.mxu0 }
 0x106   : > { %v563_v2 = vadd.f32 %v562_v0, %v2278_v50  ;;  %v651_v3 = vpop.f32.mrf.mxu1  ;;  %v739_v13 = vadd.f32 %v738_v63, %v2287_v61 }
 0x107   : > { %v652_v5 = vadd.f32 %v651_v3, %v2280_v51 }
 0x108   : > { %v1405_v6 = vpack.c.bf16 %v563_v2, %v561_v1 }
 0x109   : > { %v1485_v9 = vpack.c.bf16 %v652_v5, %v650_v4 }
 0x10a   : > { %1629 = vst [vmem:[%s2291_s2 + $0x18] sm:$0xff] %v1405_v6  }
 0x10b   : > { %1644 = vst [vmem:[%s2294_s25 + $0x18] sm:$0xff] %v1485_v9   ;;  %v622_v34 = vpop.f32.mrf.mxu3 }
 0x10c   : > { %v623_v11 = vadd.f32 %v622_v34, %v2278_v50 }
 0x10d   : > { %v740_v12 = vpop.f32.mrf.mxu2  ;;  %v565_v15 = vpop.f32.mrf.mxu0 }
 0x10e   : > { %v741_v14 = vadd.f32 %v740_v12, %v2287_v61  ;;  %v1465_v18 = vpack.c.bf16 %v623_v11, %v621_v10  ;;  %v654_v19 = vpop.f32.mrf.mxu1  ;;  %v566_v16 = vadd.f32 %v565_v15, %v2278_v50 }
 0x10f   : > { %v655_v25 = vadd.f32 %v654_v19, %v2280_v51 }
 0x110   : > { %v1565_v20 = vpack.c.bf16 %v741_v14, %v739_v13  ;;  %1641 = vst [vmem:[%s2291_s2 + $0x78] sm:$0xff] %v1465_v18  }
 0x112   : > { %1659 = vst [vmem:[%s2303_s26 + $0x18] sm:$0xff] %v1565_v20  }
 0x113   : > { %v694_v21 = vpop.f32.mrf.mxu3 }
 0x114   : > { %v695_v32 = vadd.f32 %v694_v21, %v2280_v51 }
 0x115   : > { %v743_v7 = vpop.f32.mrf.mxu2  ;;  %v567_v22 = vpop.f32.mrf.mxu0 }
 0x116   : > { %v568_v23 = vadd.f32 %v567_v22, %v2278_v50  ;;  %v656_v24 = vpop.f32.mrf.mxu1  ;;  %v744_v17 = vadd.f32 %v743_v7, %v2287_v61 }
 0x117   : > { %v657_v27 = vadd.f32 %v656_v24, %v2280_v51 }
 0x118   : > { %v1410_v29 = vpack.c.bf16 %v568_v23, %v566_v16 }
 0x119   : > { %v1490_v30 = vpack.c.bf16 %v657_v27, %v655_v25 }
 0x11a   : > { %1630 = vst [vmem:[%s2291_s2 + $0x20] sm:$0xff] %v1410_v29  }
 0x11b   : > { %1645 = vst [vmem:[%s2294_s25 + $0x20] sm:$0xff] %v1490_v30   ;;  %v696_v31 = vpop.f32.mrf.mxu3 }
 0x11c   : > { %v697_v33 = vadd.f32 %v696_v31, %v2280_v51 }
 0x11d   : > { %v745_v8 = vpop.f32.mrf.mxu2  ;;  %v570_v35 = vpop.f32.mrf.mxu0 }
 0x11e   : > { %v746_v26 = vadd.f32 %v745_v8, %v2287_v61  ;;  %v1530_v36 = vpack.c.bf16 %v697_v33, %v695_v32  ;;  %v659_v37 = vpop.f32.mrf.mxu1  ;;  %v571_v42 = vadd.f32 %v570_v35, %v2278_v50 }
 0x11f   : > { %v660_v45 = vadd.f32 %v659_v37, %v2280_v51 }
 0x120   : > { %v1570_v38 = vpack.c.bf16 %v746_v26, %v744_v17  ;;  %1653 = vst [vmem:[%s2294_s25 + $0x60] sm:$0xff] %v1530_v36  }
 0x122   : > { %1660 = vst [vmem:[%s2303_s26 + $0x20] sm:$0xff] %v1570_v38  }
 0x123   : > { %v699_v39 = vpop.f32.mrf.mxu3 }
 0x124   : > { %v700_v49 = vadd.f32 %v699_v39, %v2280_v51 }
 0x125   : > { %v748_v40 = vpop.f32.mrf.mxu2  ;;  %v572_v41 = vpop.f32.mrf.mxu0 }
 0x126   : > { %v573_v43 = vadd.f32 %v572_v41, %v2278_v50  ;;  %v661_v44 = vpop.f32.mrf.mxu1  ;;  %v749_v54 = vadd.f32 %v748_v40, %v2287_v61 }
 0x127   : > { %v662_v46 = vadd.f32 %v661_v44, %v2280_v51 }
 0x128   : > { %v1415_v28 = vpack.c.bf16 %v573_v43, %v571_v42 }
 0x129   : > { %v1495_v47 = vpack.c.bf16 %v662_v46, %v660_v45 }
 0x12a   : > { %1631 = vst [vmem:[%s2291_s2 + $0x28] sm:$0xff] %v1415_v28  }
 0x12b   : > { %1646 = vst [vmem:[%s2294_s25 + $0x28] sm:$0xff] %v1495_v47   ;;  %v701_v48 = vpop.f32.mrf.mxu3 }
 0x12c   : > { %v702_v52 = vadd.f32 %v701_v48, %v2280_v51 }
 0x12d   : > { %v750_v53 = vpop.f32.mrf.mxu2  ;;  %v575_v56 = vpop.f32.mrf.mxu0 }
 0x12e   : > { %v751_v55 = vadd.f32 %v750_v53, %v2287_v61  ;;  %v1535_v57 = vpack.c.bf16 %v702_v52, %v700_v49  ;;  %v664_v58 = vpop.f32.mrf.mxu1  ;;  %v576_v0 = vadd.f32 %v575_v56, %v2278_v50 }
 0x12f   : > { %v665_v3 = vadd.f32 %v664_v58, %v2280_v51 }
 0x130   : > { %v1575_v59 = vpack.c.bf16 %v751_v55, %v749_v54  ;;  %1654 = vst [vmem:[%s2294_s25 + $0x68] sm:$0xff] %v1535_v57  }
 0x132   : > { %1661 = vst [vmem:[%s2303_s26 + $0x28] sm:$0xff] %v1575_v59  }
 0x133   : > { %v704_v60 = vpop.f32.mrf.mxu3 }
 0x134   : > { %v705_v34 = vadd.f32 %v704_v60, %v2280_v51 }
 0x135   : > { %v753_v62 = vpop.f32.mrf.mxu2  ;;  %v577_v63 = vpop.f32.mrf.mxu0 }
 0x136   : > { %v578_v1 = vadd.f32 %v577_v63, %v2278_v50  ;;  %v666_v2 = vpop.f32.mrf.mxu1  ;;  %v754_v12 = vadd.f32 %v753_v62, %v2287_v61 }
 0x137   : > { %v667_v4 = vadd.f32 %v666_v2, %v2280_v51 }
 0x138   : > { %v1420_v5 = vpack.c.bf16 %v578_v1, %v576_v0 }
 0x139   : > { %v1500_v6 = vpack.c.bf16 %v667_v4, %v665_v3 }
 0x13a   : > { %1632 = vst [vmem:[%s2291_s2 + $0x30] sm:$0xff] %v1420_v5  }
 0x13b   : > { %1647 = vst [vmem:[%s2294_s25 + $0x30] sm:$0xff] %v1500_v6   ;;  %v706_v9 = vpop.f32.mrf.mxu3 }
 0x13c   : > { %v707_v10 = vadd.f32 %v706_v9, %v2280_v51 }
 0x13d   : > { %v755_v11 = vpop.f32.mrf.mxu2  ;;  %v580_v14 = vpop.f32.mrf.mxu0 }
 0x13e   : > { %v756_v13 = vadd.f32 %v755_v11, %v2287_v61  ;;  %v1540_v15 = vpack.c.bf16 %v707_v10, %v705_v34  ;;  %v669_v18 = vpop.f32.mrf.mxu1  ;;  %v581_v22 = vadd.f32 %v580_v14, %v2278_v50 }
 0x13f   : > { %v670_v24 = vadd.f32 %v669_v18, %v2280_v51 }
 0x140   : > { %v1580_v19 = vpack.c.bf16 %v756_v13, %v754_v12  ;;  %1655 = vst [vmem:[%s2294_s25 + $0x70] sm:$0xff] %v1540_v15  }
 0x142   : > { %1662 = vst [vmem:[%s2303_s26 + $0x30] sm:$0xff] %v1580_v19  }
 0x143   : > { %v709_v20 = vpop.f32.mrf.mxu3 }
 0x144   : > { %v710_v31 = vadd.f32 %v709_v20, %v2280_v51 }
 0x145   : > { %v758_v21 = vpop.f32.mrf.mxu2  ;;  %v582_v7 = vpop.f32.mrf.mxu0 }
 0x146   : > { %v583_v16 = vadd.f32 %v582_v7, %v2278_v50  ;;  %v671_v23 = vpop.f32.mrf.mxu1  ;;  %v759_v8 = vadd.f32 %v758_v21, %v2287_v61 }
 0x147   : > { %v672_v25 = vadd.f32 %v671_v23, %v2280_v51 }
 0x148   : > { %v1425_v27 = vpack.c.bf16 %v583_v16, %v581_v22 }
 0x149   : > { %v1505_v29 = vpack.c.bf16 %v672_v25, %v670_v24 }
 0x14a   : > { %1633 = vst [vmem:[%s2291_s2 + $0x38] sm:$0xff] %v1425_v27  }
 0x14b   : > { %1648 = vst [vmem:[%s2294_s25 + $0x38] sm:$0xff] %v1505_v29   ;;  %v711_v30 = vpop.f32.mrf.mxu3 }
 0x14c   : > { %v712_v32 = vadd.f32 %v711_v30, %v2280_v51 }
 0x14d   : > { %v760_v33 = vpop.f32.mrf.mxu2  ;;  %v585_v26 = vpop.f32.mrf.mxu0 }
 0x14e   : > { %v761_v17 = vadd.f32 %v760_v33, %v2287_v61  ;;  %v1545_v35 = vpack.c.bf16 %v712_v32, %v710_v31  ;;  %v674_v36 = vpop.f32.mrf.mxu1  ;;  %v586_v41 = vadd.f32 %v585_v26, %v2278_v50 }
 0x14f   : > { %v675_v44 = vadd.f32 %v674_v36, %v2280_v51 }
 0x150   : > { %v1585_v37 = vpack.c.bf16 %v761_v17, %v759_v8  ;;  %1656 = vst [vmem:[%s2294_s25 + $0x78] sm:$0xff] %v1545_v35  }
 0x152   : > { %1663 = vst [vmem:[%s2303_s26 + $0x38] sm:$0xff] %v1585_v37  }
 0x153   : > { %v783_v38 = vpop.f32.mrf.mxu3 }
 0x154   : > { %v784_v48 = vadd.f32 %v783_v38, %v2287_v61 }
 0x155   : > { %v763_v39 = vpop.f32.mrf.mxu2  ;;  %v587_v40 = vpop.f32.mrf.mxu0 }
 0x156   : > { %v588_v42 = vadd.f32 %v587_v40, %v2278_v50  ;;  %v676_v43 = vpop.f32.mrf.mxu1  ;;  %v764_v53 = vadd.f32 %v763_v39, %v2287_v61 }
 0x157   : > { %v677_v45 = vadd.f32 %v676_v43, %v2280_v51 }
 0x158   : > { %v1430_v46 = vpack.c.bf16 %v588_v42, %v586_v41 }
 0x159   : > { %v1510_v28 = vpack.c.bf16 %v677_v45, %v675_v44 }
 0x15a   : > { %1634 = vst [vmem:[%s2291_s2 + $0x40] sm:$0xff] %v1430_v46  }
 0x15b   : > { %1649 = vst [vmem:[%s2294_s25 + $0x40] sm:$0xff] %v1510_v28   ;;  %v785_v47 = vpop.f32.mrf.mxu3 }
 0x15c   : > { %v786_v52 = vadd.f32 %v785_v47, %v2287_v61 }
 0x15d   : > { %v765_v49 = vpop.f32.mrf.mxu2  ;;  %v590_v55 = vpop.f32.mrf.mxu0 }
 0x15e   : > { %v766_v54 = vadd.f32 %v765_v49, %v2287_v61  ;;  %v1610_v56 = vpack.c.bf16 %v786_v52, %v784_v48  ;;  %v679_v57 = vpop.f32.mrf.mxu1  ;;  %v591_v63 = vadd.f32 %v590_v55, %v2278_v50 }
 0x15f   : > { %v680_v2 = vadd.f32 %v679_v57, %v2280_v51 }
 0x160   : > { %v1590_v58 = vpack.c.bf16 %v766_v54, %v764_v53  ;;  %1668 = vst [vmem:[%s2303_s26 + $0x60] sm:$0xff] %v1610_v56  }
 0x162   : > { %1664 = vst [vmem:[%s2303_s26 + $0x40] sm:$0xff] %v1590_v58  }
 0x163   : > { %v788_v59 = vpop.f32.mrf.mxu3 }
 0x164   : > { %v789_v9 = vadd.f32 %v788_v59, %v2287_v61 }
 0x165   : > { %v768_v60 = vpop.f32.mrf.mxu2  ;;  %v592_v62 = vpop.f32.mrf.mxu0 }
 0x166   : > { %v593_v0 = vadd.f32 %v592_v62, %v2278_v50  ;;  %v681_v1 = vpop.f32.mrf.mxu1  ;;  %v769_v11 = vadd.f32 %v768_v60, %v2287_v61 }
 0x167   : > { %v682_v3 = vadd.f32 %v681_v1, %v2280_v51 }
 0x168   : > { %v1435_v4 = vpack.c.bf16 %v593_v0, %v591_v63 }
 0x169   : > { %v1515_v5 = vpack.c.bf16 %v682_v3, %v680_v2 }
 0x16a   : > { %1635 = vst [vmem:[%s2291_s2 + $0x48] sm:$0xff] %v1435_v4  }
 0x16b   : > { %1650 = vst [vmem:[%s2294_s25 + $0x48] sm:$0xff] %v1515_v5   ;;  %v790_v6 = vpop.f32.mrf.mxu3 }
 0x16c   : > { %v791_v10 = vadd.f32 %v790_v6, %v2287_v61 }
 0x16d   : > { %v770_v34 = vpop.f32.mrf.mxu2  ;;  %v595_v13 = vpop.f32.mrf.mxu0 }
 0x16e   : > { %v771_v12 = vadd.f32 %v770_v34, %v2287_v61  ;;  %v1615_v14 = vpack.c.bf16 %v791_v10, %v789_v9  ;;  %v684_v15 = vpop.f32.mrf.mxu1  ;;  %v596_v7 = vadd.f32 %v595_v13, %v2278_v50 }
 0x16f   : > { %v685_v23 = vadd.f32 %v684_v15, %v2280_v51 }
 0x170   : > { %v1595_v18 = vpack.c.bf16 %v771_v12, %v769_v11  ;;  %1669 = vst [vmem:[%s2303_s26 + $0x68] sm:$0xff] %v1615_v14  }
 0x172   : > { %1665 = vst [vmem:[%s2303_s26 + $0x48] sm:$0xff] %v1595_v18  }
 0x173   : > { %v793_v19 = vpop.f32.mrf.mxu3 }
 0x174   : > { %v794_v30 = vadd.f32 %v793_v19, %v2287_v61 }
 0x175   : > { %v773_v20 = vpop.f32.mrf.mxu2  ;;  %v597_v21 = vpop.f32.mrf.mxu0 }
 0x176   : > { %v598_v22 = vadd.f32 %v597_v21, %v2278_v50  ;;  %v686_v16 = vpop.f32.mrf.mxu1  ;;  %v774_v33 = vadd.f32 %v773_v20, %v2287_v61 }
 0x177   : > { %v687_v24 = vadd.f32 %v686_v16, %v2280_v51 }
 0x178   : > { %v1440_v25 = vpack.c.bf16 %v598_v22, %v596_v7 }
 0x179   : > { %v1520_v27 = vpack.c.bf16 %v687_v24, %v685_v23 }
 0x17a   : > { %1636 = vst [vmem:[%s2291_s2 + $0x50] sm:$0xff] %v1440_v25  }
 0x17b   : > { %1651 = vst [vmem:[%s2294_s25 + $0x50] sm:$0xff] %v1520_v27   ;;  %v795_v29 = vpop.f32.mrf.mxu3 }
 0x17c   : > { %v796_v32 = vadd.f32 %v795_v29, %v2287_v61 }
 0x17d   : > { %v775_v31 = vpop.f32.mrf.mxu2  ;;  %v600_v17 = vpop.f32.mrf.mxu0 }
 0x17e   : > { %v776_v8 = vadd.f32 %v775_v31, %v2287_v61  ;;  %v1620_v26 = vpack.c.bf16 %v796_v32, %v794_v30  ;;  %v689_v35 = vpop.f32.mrf.mxu1  ;;  %v601_v40 = vadd.f32 %v600_v17, %v2278_v50 }
 0x17f   : > { %v690_v43 = vadd.f32 %v689_v35, %v2280_v51 }
 0x180   : > { %v1600_v36 = vpack.c.bf16 %v776_v8, %v774_v33  ;;  %1670 = vst [vmem:[%s2303_s26 + $0x70] sm:$0xff] %v1620_v26  }
 0x182   : > { %1666 = vst [vmem:[%s2303_s26 + $0x50] sm:$0xff] %v1600_v36  }
 0x183   : > { %v798_v37 = vpop.f32.mrf.mxu3 }
 0x184   : > { %v799_v46 = vadd.f32 %v798_v37, %v2287_v61 }
 0x185   : > { %v778_v38 = vpop.f32.mrf.mxu2  ;;  %v602_v39 = vpop.f32.mrf.mxu0 }
 0x186   : > { %v603_v41 = vadd.f32 %v602_v39, %v2278_v50  ;;  %v691_v42 = vpop.f32.mrf.mxu1 }
 0x187   : > { %v692_v44 = vadd.f32 %v691_v42, %v2280_v51 }
 0x188   : > { %v1445_v45 = vpack.c.bf16 %v603_v41, %v601_v40 }
 0x189   : > { %v1525_v50 = vpack.c.bf16 %v692_v44, %v690_v43 }
 0x18a   : > { %1637 = vst [vmem:[%s2291_s2 + $0x58] sm:$0xff] %v1445_v45  }
 0x18b   : > { %1652 = vst [vmem:[%s2294_s25 + $0x58] sm:$0xff] %v1525_v50   ;;  %v800_v51 = vpop.f32.mrf.mxu3 }
 0x18c   : > { %v801_v47 = vadd.f32 %v800_v51, %v2287_v61 }
 0x18d   : > { %v780_v28 = vpop.f32.mrf.mxu2 }
 0x18e   : > { %1912 = shalt.err (!%p1909_p0)
}
 0x18f   : > { %s2039_s16 = smov 64   ;;  %s2040_s9 = smov 4   ;;  %v779_v48 = vadd.f32 %v778_v38, %v2287_v61  ;;  %v781_v49 = vadd.f32 %v780_v28, %v2287_v61 }
 0x190   : > { %1707 = dma.vmem_to_hbm [thread:$0]  (%p2152_p7), %s2450_s12, 2048, %s1042_s21, %s2466_s11, %s2039_s16, %s2039_s16, %s2040_s9  }
 0x191   : > { %s996_s1 = scalar_lea.sflag [#allocation4], %s2173_s17  ;;  %s1927_s6 = sshra.s32 %s1023_s30, 4  ;;  %s1928_s6 = int_to_ptr.hbm [resolvable:$true] %s1927_s6 }
 0x192   : > { %s1929_s13 = scalar_lea.hbm %s1928_s6, 128  ;;  %s1933_s14 = scalar_lea.hbm %s2555_s3, 256 }
 0x193   : > { %p1930_p3 = scmp.ne.s32.totalorder %s1928_s6, %s1929_s13  ;;  %p1934_p2 = scmp.lt.s32.totalorder %s1928_s6, %s2555_s3 }
 0x194   : > { %p1935_p1 = scmp.lt.s32.totalorder %s1933_s14, %s1929_s13 }
 0x195   : > { %p1931_p5 = pnand %p1930_p3, %p2152_p7 }
 0x196   : > { %p1936_p4 = por %p1935_p1, %p1934_p2 }
 0x197   : > { %p1932_p9 = pneg %p1931_p5 }
 0x199   : > { %p1937_p8 = pnand %p1936_p4, %p1932_p9 }
 0x19b   : > { %1940 = shalt.err (!%p1937_p8)
}
 0x19c   : > { %1706 = dma.vmem_to_hbm [thread:$0]  (%p2152_p7), %s2457_s24, 2048, %s1023_s30, %s996_s1, %s2039_s16, %s2039_s16, %s2040_s9   ;;  %v1625_v61 = vpack.c.bf16 %v801_v47, %v799_v46  ;;  %v1605_v52 = vpack.c.bf16 %v781_v49, %v779_v48 }
 0x19d   : > { %s1955_s17 = sshra.s32 %s1061_s28, 4  ;;  %s1961_s13 = scalar_lea.hbm %s2557_s5, 256  ;;  %s1956_s17 = int_to_ptr.hbm [resolvable:$true] %s1955_s17 }
 0x19e   : > { %1671 = vst [vmem:[%s2303_s26 + $0x78] sm:$0xff] %v1625_v61   ;;  %s1957_s12 = scalar_lea.hbm %s1956_s17, 128  ;;  %p1962_p0 = scmp.lt.s32.totalorder %s1956_s17, %s2557_s5 }
 0x19f   : > { %1667 = vst [vmem:[%s2303_s26 + $0x58] sm:$0xff] %v1605_v52   ;;  %p1958_p10 = scmp.ne.s32.totalorder %s1956_s17, %s1957_s12  ;;  %p1963_p3 = scmp.lt.s32.totalorder %s1961_s13, %s1957_s12 }
 0x1a1   : > { %p1959_p12 = pnand %p1958_p10, %p2152_p7  ;;  %p1964_p5 = por %p1963_p3, %p1962_p0 }
 0x1a3   : > { %p1960_p13 = pneg %p1959_p12 }
 0x1a5   : > { %p1965_p9 = pnand %p1964_p5, %p1960_p13 }
 0x1a7   : > { %1968 = shalt.err (!%p1965_p9)
}
 0x1a8   : > { %1708 = dma.vmem_to_hbm [thread:$0]  (%p2152_p7), %s1059_s7, 2048, %s1061_s28, %s2466_s11, %s2039_s16, %s2039_s16, %s2040_s9  }
 0x1a9 PF: > { %s1075_s26 = sand.u32 1, %s2011_s18   ;;  %p1724_p2 = pnand %p1241_p11, %p2118_p6 }
 0x1aa   : > { %s1076_s30 = scalar_lea.sflag [#allocation4], %s1075_s26 }
 0x1ab   : > { %p1725_p1 = pneg %p1724_p2 }
 0x1ad   : > { %2002 = dma.done.wait (%p1725_p1), %s1076_s30, 2048  }
 0x1ae   : > { %2004 = vsyncadd (%p1725_p1), %s1076_s30, 4294965248  ;;  %s2570_s1 = sadd.s32 4294967294, %s2031_s23  }
 0x1af   : > { %s1085_s29 = sand.u32 1, %s2570_s1  }
 0x1b0   : > { %s1086_s25 = scalar_lea.sflag [#allocation10], %s1085_s29 }
 0x1b1   : > { %2006 = dma.done.wait (%p1725_p1), %s1086_s25, 4096  }
 0x1b2   : > { %2008 = vsyncadd (%p1725_p1), %s1086_s25, 4294963200  ;;  %s26_s23 = sadd.s32 1, %s2031_s23   ;;  %s2571_s27 = sld [smem:[#allocation16_spill]] }
 0x1b3   : > { %p23_p7 = scmp.ge.s32.totalorder %s26_s23, 4   ;;  %s2572_s18 = smov %s2015_s19 }
 0x1b4   : > { %s2573_s19 = smov %s2019_s20  ;;  %s2574_s20 = smov %s2161_s10 }
 0x1b5   : > { %s2575_s21 = smov %s2027_s22  ;;  %25 = sbr.rel (!%p23_p7) target bundleno = 12 (0xc), region = 117 }
 0x1b8   : > { %s2576_s22 = smov %s2571_s27 }
 0x1ba   :  { %1102 = vsyncpa [#allocation3], 1 }
 0x1bb   :  { %1104 = vsyncpa [#allocation3 + $0x1], 1 }
 0x1bc   :  { %1105 = vsyncpa [#allocation6], 1 }
 0x1bd   :  { %1106 = vsyncpa [#allocation4], 1 }
 0x1be   :  { %1108 = vsyncpa [#allocation4 + $0x1], 1 }
 0x1bf   :  { %1109 = vsyncpa [#allocation10], 1 }
 0x1c0   :  { %1111 = vsyncpa [#allocation10 + $0x1], 1 }

</bundles_post_ra>
